<compile_context>
chip_gen: v7x
topology: tpu7x:2x2x1
jax: 0.10.0
libtpu: 0.0.40
codegen_flags: <defaults>
</compile_context>

<pallas_src>
import functools

import numpy as np
import jax
import jax.numpy as jnp
from jax.experimental import pallas as pl
from jax.experimental.pallas import tpu as pltpu


def _sharpen_kernel(sigma_ref, masks_ref, x_ref, out_ref, *, W):
    # sigma_ref: (1,) f32 in SMEM
    # masks_ref: (4, H*W) f32 {0,1} edge-validity masks [left, right, up, down]
    # x_ref    : (1, TBC, H*W) block of flattened planes
    # out_ref  : (1, TBC, H*W)
    x = x_ref[0]
    if x.dtype != jnp.float32:
        x = x.astype(jnp.float32)
    HW = x.shape[-1]

    m = masks_ref[...]
    mask_l = m[0:1, :]
    mask_r = m[1:2, :]
    mask_u = m[2:3, :]
    mask_d = m[3:4, :]

    # Horizontal 3-tap sum (left + center + right) with zero padding at row edges.
    left = pltpu.roll(x, shift=1, axis=1) * mask_l            # value from j-1
    right = pltpu.roll(x, shift=HW - 1, axis=1) * mask_r      # value from j+1
    rowsum = left + x + right

    # Vertical 3-tap sum of row sums with zero padding at top/bottom edges.
    up = pltpu.roll(rowsum, shift=W, axis=1) * mask_u          # row i-1
    down = pltpu.roll(rowsum, shift=HW - W, axis=1) * mask_d   # row i+1
    box = up + rowsum + down

    # 3x3 sharpen: 8*center - neighbors == 9*center - full box sum.
    conv = 9.0 * x - box
    sigma = sigma_ref[0]
    out_ref[0] = (sigma * jnp.abs(conv)).astype(out_ref.dtype)


def _choose_tbc(N, HW, bytes_per_elem, budget_bytes=1 * 1024 * 1024):
    """Planes per grid step: ~1 MiB input blocks, TBC must divide N."""
    per_plane = max(1, HW * bytes_per_elem)
    tbc = max(1, min(N, budget_bytes // per_plane))
    # Prefer >= 2 grid steps (v7x has 2 TensorCores) when blocks stay large.
    if tbc == N and N >= 16:
        tbc = -(-N // 2)
    while N % tbc:
        tbc -= 1
    return tbc


def sharpen(x, sigma):
    """x: (B, 3, H, W) NCHW. Returns sigma * |depthwise 3x3 sharpen(x)|."""
    B, C, H, W = x.shape
    assert C == 3, "Sharpen module is defined for 3-channel input (groups=3)."
    N = B * C
    HW = H * W

    TBC = _choose_tbc(N, HW, jnp.dtype(x.dtype).itemsize)
    G = N // TBC

    # Free reshapes only (contiguous dim merges) -- no extra HBM pass.
    x2 = x.reshape(G, TBC, HW)

    # Edge-validity masks, built as host constants (numpy) once per shape.
    col = np.arange(HW, dtype=np.int64) % W
    row = np.arange(HW, dtype=np.int64) // W
    masks = jnp.asarray(
        np.stack(
            [
                (col != 0).astype(np.float32),      # left neighbor valid
                (col != W - 1).astype(np.float32),  # right neighbor valid
                (row != 0).astype(np.float32),      # upper neighbor valid
                (row != H - 1).astype(np.float32),  # lower neighbor valid
            ],
            axis=0,
        )
    )

    sigma_arr = jnp.reshape(jnp.asarray(sigma, dtype=jnp.float32), (1,))

    block_bytes = TBC * HW * jnp.dtype(x.dtype).itemsize
    vmem_limit = int(min(64 * 1024 * 1024, max(32 * 1024 * 1024, 16 * block_bytes)))

    kernel = functools.partial(_sharpen_kernel, W=W)

    out = pl.pallas_call(
        kernel,
        out_shape=jax.ShapeDtypeStruct((G, TBC, HW), x.dtype),
        grid_spec=pltpu.PrefetchScalarGridSpec(
            num_scalar_prefetch=0,
            grid=(G,),
            in_specs=[
                pl.BlockSpec(memory_space=pltpu.MemorySpace.SMEM),     # sigma
                pl.BlockSpec((4, HW), lambda i: (0, 0)),               # masks (resident)
                pl.BlockSpec((1, TBC, HW), lambda i: (i, 0, 0)),       # x planes
            ],
            out_specs=pl.BlockSpec((1, TBC, HW), lambda i: (i, 0, 0)),
        ),
        compiler_params=pltpu.CompilerParams(
            dimension_semantics=("parallel",),
            vmem_limit_bytes=vmem_limit,
        ),
    )(sigma_arr, masks, x2)

    return out.reshape(B, C, H, W)


def _reference(x, sigma):
    # Pure-JAX reference of the PyTorch forward (depthwise 3x3 conv, pad=1).
    k = jnp.array([[-1., -1., -1.], [-1., 8., -1.], [-1., -1., -1.]], jnp.float32)
    xpad = jnp.pad(x, ((0, 0), (0, 0), (1, 1), (1, 1)))
    B, C, H, W = x.shape
    out = jnp.zeros((B, C, H, W), jnp.float32)
    for di in range(3):
        for dj in range(3):
            out = out + k[di, dj] * xpad[:, :, di:di + H, dj:dj + W]
    return sigma * jnp.abs(out)


if __name__ == "__main__":
    key = jax.random.PRNGKey(0)
    B, C, H, W = 2, 3, 16, 16
    sigma = 0.5
    x = jax.random.normal(key, (B, C, H, W), dtype=jnp.float32)

    out = jax.block_until_ready(sharpen(x, sigma))
    ref = _reference(x, sigma)

    assert out.shape == (B, C, H, W)
    assert jnp.allclose(out, ref, atol=1e-4, rtol=1e-4), "mismatch vs reference"

    print("KERNEL_OK")
</pallas_src>

<mosaic_0001>
module attributes {stable_mosaic.version = 11 : i64} {
  func.func @_sharpen_kernel(%arg0: i32, %arg1: memref<1xf32, #tpu.memory_space<smem>>, %arg2: memref<4x256xf32, #tpu.memory_space<vmem>>, %arg3: memref<1x6x256xf32, #tpu.memory_space<vmem>>, %arg4: memref<1x6x256xf32, #tpu.memory_space<vmem>>) attributes {dimension_semantics = [#tpu.dimension_semantics<parallel>], iteration_bounds = array<i64: 1>, scalar_prefetch = 0 : i64, scratch_operands = 0 : i64, tpu.core_type = #tpu.core_type<tc>, window_params = [{transform_indices = @transform_0, window_bounds = array<i64: 1>}, {pipeline_mode = #tpu.pipeline_mode<synchronous>, transform_indices = @transform_1, window_bounds = array<i64: 4, 256>}, {transform_indices = @transform_2, window_bounds = array<i64: 1, 6, 256>}, {transform_indices = @transform_3, window_bounds = array<i64: 1, 6, 256>}]} {
    %c0 = arith.constant 0 : index
    %c0_0 = arith.constant 0 : index
    %c0_1 = arith.constant 0 : index
    %0 = vector.load %arg3[%c0, %c0_0, %c0_1] : memref<1x6x256xf32, #tpu.memory_space<vmem>>, vector<1x6x256xf32>
    %1 = vector.shape_cast %0 : vector<1x6x256xf32> to vector<6x256xf32>
    %c0_2 = arith.constant 0 : index
    %c0_3 = arith.constant 0 : index
    %2 = vector.load %arg2[%c0_2, %c0_3] : memref<4x256xf32, #tpu.memory_space<vmem>>, vector<4x256xf32>
    %3 = vector.extract_strided_slice %2 {offsets = [0, 0], sizes = [1, 256], strides = [1, 1]} : vector<4x256xf32> to vector<1x256xf32>
    %4 = vector.extract_strided_slice %2 {offsets = [1, 0], sizes = [1, 256], strides = [1, 1]} : vector<4x256xf32> to vector<1x256xf32>
    %5 = vector.extract_strided_slice %2 {offsets = [2, 0], sizes = [1, 256], strides = [1, 1]} : vector<4x256xf32> to vector<1x256xf32>
    %6 = vector.extract_strided_slice %2 {offsets = [3, 0], sizes = [1, 256], strides = [1, 1]} : vector<4x256xf32> to vector<1x256xf32>
    %c1_i32 = arith.constant 1 : i32
    %7 = tpu.dynamic_rotate %1 by %c1_i32 dim 1 : vector<6x256xf32>, i32 -> vector<6x256xf32>
    %8 = vector.broadcast %3 : vector<1x256xf32> to vector<6x256xf32>
    %9 = arith.mulf %7, %8 : vector<6x256xf32>
    %c255_i32 = arith.constant 255 : i32
    %10 = tpu.dynamic_rotate %1 by %c255_i32 dim 1 : vector<6x256xf32>, i32 -> vector<6x256xf32>
    %11 = vector.broadcast %4 : vector<1x256xf32> to vector<6x256xf32>
    %12 = arith.mulf %10, %11 : vector<6x256xf32>
    %13 = arith.addf %9, %1 : vector<6x256xf32>
    %14 = arith.addf %13, %12 : vector<6x256xf32>
    %c16_i32 = arith.constant 16 : i32
    %15 = tpu.dynamic_rotate %14 by %c16_i32 dim 1 : vector<6x256xf32>, i32 -> vector<6x256xf32>
    %16 = vector.broadcast %5 : vector<1x256xf32> to vector<6x256xf32>
    %17 = arith.mulf %15, %16 : vector<6x256xf32>
    %c240_i32 = arith.constant 240 : i32
    %18 = tpu.dynamic_rotate %14 by %c240_i32 dim 1 : vector<6x256xf32>, i32 -> vector<6x256xf32>
    %19 = vector.broadcast %6 : vector<1x256xf32> to vector<6x256xf32>
    %20 = arith.mulf %18, %19 : vector<6x256xf32>
    %21 = arith.addf %17, %14 : vector<6x256xf32>
    %22 = arith.addf %21, %20 : vector<6x256xf32>
    %cst = arith.constant 9.000000e+00 : f32
    %23 = vector.broadcast %cst : f32 to vector<6x256xf32>
    %24 = arith.mulf %23, %1 : vector<6x256xf32>
    %25 = arith.subf %24, %22 : vector<6x256xf32>
    %c0_4 = arith.constant 0 : index
    %26 = memref.load %arg1[%c0_4] : memref<1xf32, #tpu.memory_space<smem>>
    %27 = math.absf %25 : vector<6x256xf32>
    %28 = vector.broadcast %26 : f32 to vector<6x256xf32>
    %29 = arith.mulf %28, %27 : vector<6x256xf32>
    %c0_5 = arith.constant 0 : index
    %c0_6 = arith.constant 0 : index
    %c0_7 = arith.constant 0 : index
    %30 = vector.load %arg4[%c0_5, %c0_6, %c0_7] : memref<1x6x256xf32, #tpu.memory_space<vmem>>, vector<1x6x256xf32>
    %31 = vector.shape_cast %30 : vector<1x6x256xf32> to vector<6x256xf32>
    %32 = vector.shape_cast %29 : vector<6x256xf32> to vector<1x6x256xf32>
    tpu.vector_store %arg4[%c0_5, %c0_6, %c0_7], %32 {strides = array<i32>} : memref<1x6x256xf32, #tpu.memory_space<vmem>>, vector<1x6x256xf32>,
    return
  }
  func.func @transform_0(%arg0: i32) -> i32 {
    %c0_i32 = arith.constant 0 : i32
    %c0_i32_0 = arith.constant 0 : i32
    return %c0_i32 : i32
  }
  func.func @transform_1(%arg0: i32) -> (i32, i32) {
    %c0_i32 = arith.constant 0 : i32
    %c0_i32_0 = arith.constant 0 : i32
    %c0_i32_1 = arith.constant 0 : i32
    return %c0_i32, %c0_i32_0 : i32, i32
  }
  func.func @transform_2(%arg0: i32) -> (i32, i32, i32) {
    %c0_i32 = arith.constant 0 : i32
    %c0_i32_0 = arith.constant 0 : i32
    %c0_i32_1 = arith.constant 0 : i32
    return %arg0, %c0_i32, %c0_i32_0 : i32, i32, i32
  }
  func.func @transform_3(%arg0: i32) -> (i32, i32, i32) {
    %c0_i32 = arith.constant 0 : i32
    %c0_i32_0 = arith.constant 0 : i32
    %c0_i32_1 = arith.constant 0 : i32
    return %arg0, %c0_i32, %c0_i32_0 : i32, i32, i32
  }
}

</mosaic_0001>

<bundles_post_ra>
// kernel: tpu_custom_call.1
= control target key start
LH: loop header
LB: loop body
LE: loop exit
PB: predicated region body
PF: predicated region fallthrough
CT: control target
= control target key end

     0   :  { %s157_s14 = smov 127   ;;  %s158_s15 = smov 1   ;;  %v22_v2 = vlaneseq  ;;  %s211_s2 = inlined_call_operand.vmem [shape: f32[1,6,256], index: 2, kind: input, shape index: {}]   ;;  %s212_s1 = inlined_call_operand.vmem [shape: f32[4,256], index: 1, kind: input, shape index: {}]   ;;  %s213_s0 = inlined_call_operand.<no memory space> [shape: f32[1], index: 0, kind: input, shape index: {}]   ;;  %s214_s3 = inlined_call_operand.vmem [shape: f32[1,6,256], index: 3, kind: output, shape index: {}]  }
   0x1   :  { %v184_v0 = vld [vmem:[%s211_s2] sm:$0x3f]  ;;  %v191_v1 = vld [vmem:[%s211_s2 + $0x8] sm:$0x3f]  ;;  %s160_s2 = smov 112  }
   0x2   :  { %48 = vrot.lane.b32.xlu1 %v184_v0, %s157_s14  ;;  %18 = vrot.lane.b32.xlu0 %v184_v0, %s158_s15  ;;  %v29_v3 = vshrl.u32 %v22_v2, 7  ;;  %v17_v6 = vld [vmem:[%s212_s1] sm:$0xff]  ;;  %v23_v9 = vand.u32 127, %v22_v2  ;;  %s159_s1 = smov 16   ;;  %v137_v54 = vmul.f32 9.0, %v184_v0  ;;  %v138_v55 = vmul.f32 9.0, %v191_v1 }
   0x4   :  { %v30_v4 = vsub.s32 0, %v29_v3  ;;  %v34_v5 = vsub.s32 4, %v29_v3  ;;  %v57_v7 = vsub.s32 1, %v29_v3  ;;  %v61_v8 = vsub.s32 5, %v29_v3 }
   0x5   :  { %vm52_vm0 = vcmp.lt.s32.totalorder %v23_v9, 127  ;;  %vm24_vm1 = vcmp.lt.s32.totalorder %v23_v9, 1  ;;  %v88_v34 = vsub.s32 2, %v29_v3  ;;  %v92_v35 = vsub.s32 6, %v29_v3 }
   0x6   :  { %50 = vrot.lane.b32.xlu1 %v191_v1, %s157_s14  ;;  %20 = vrot.lane.b32.xlu0 %v191_v1, %s158_s15  ;;  %v31_v10 = vrot.slane %v17_v6, %v30_v4  ;;  %v35_v11 = vrot.slane %v17_v6, %v34_v5  ;;  %v58_v14 = vrot.slane %v17_v6, %v57_v7  ;;  %v115_v38 = vsub.s32 3, %v29_v3 }
   0x7   :  { %v62_v15 = vrot.slane %v17_v6, %v61_v8  ;;  %v89_v36 = vrot.slane %v17_v6, %v88_v34  ;;  %v93_v37 = vrot.slane %v17_v6, %v92_v35  ;;  %v119_v39 = vsub.s32 7, %v29_v3 }
   0x8   :  { %v41_v16 = vrot.slane %v31_v10, %v30_v4  ;;  %v45_v17 = vrot.slane %v35_v11, %v30_v4  ;;  %v68_v19 = vrot.slane %v58_v14, %v57_v7  ;;  %vm83_vm2 = vcmp.lt.s32.totalorder %v23_v9, 16 }
   0x9   :  { %v72_v20 = vrot.slane %v62_v15, %v57_v7  ;;  %v99_v40 = vrot.slane %v89_v36, %v88_v34  ;;  %v103_v41 = vrot.slane %v93_v37, %v88_v34  ;;  %v116_v42 = vrot.slane %v17_v6, %v115_v38 }
   0xa   :  { %v120_v43 = vrot.slane %v17_v6, %v119_v39  ;;  %vm110_vm3 = vcmp.lt.s32.totalorder %v23_v9, 112  ;;  %v144_v4 = vstv %s213_s0 }
   0xb   :  { %v126_v50 = vrot.slane %v116_v42, %v115_v38 }
   0xc   :  { %v130_v51 = vrot.slane %v120_v43, %v115_v38 }
  0x74   :  { %v49_v12 = vpop.permute.xlu1 %48  ;;  %v19_v13 = vpop.permute.xlu0 %18 }
  0x78   :  { %v51_v18 = vpop.permute.xlu1 %50  ;;  %v21_v21 = vpop.permute.xlu0 %20 }
  0x79   :  { %v53_v22 = vsel %vm52_vm0, %v49_v12, %v51_v18  ;;  %v54_v23 = vsel %vm52_vm0, %v51_v18, %v49_v12  ;;  %v25_v24 = vsel %vm24_vm1, %v19_v13, %v21_v21  ;;  %v26_v25 = vsel %vm24_vm1, %v21_v21, %v19_v13 }
  0x7a   :  { %v46_v26 = vmul.f32 %v41_v16, %v26_v25  ;;  %v47_v27 = vmul.f32 %v45_v17, %v25_v24  ;;  %v73_v28 = vmul.f32 %v68_v19, %v53_v22  ;;  %v74_v29 = vmul.f32 %v72_v20, %v54_v23 }
  0x7c   :  { %v75_v30 = vadd.f32 %v46_v26, %v184_v0  ;;  %v76_v31 = vadd.f32 %v47_v27, %v191_v1 }
  0x7e   :  { %v78_v32 = vadd.f32 %v76_v31, %v74_v29  ;;  %v77_v33 = vadd.f32 %v75_v30, %v73_v28 }
  0x80   :  { %81 = vrot.lane.b32.xlu1 %v78_v32, %s159_s1  ;;  %79 = vrot.lane.b32.xlu0 %v77_v33, %s159_s1 }
  0x84   :  { %108 = vrot.lane.b32.xlu1 %v78_v32, %s160_s2  ;;  %106 = vrot.lane.b32.xlu0 %v77_v33, %s160_s2 }
  0xf2   :  { %v82_v44 = vpop.permute.xlu1 %81  ;;  %v80_v45 = vpop.permute.xlu0 %79 }
  0xf3   :  { %v84_v46 = vsel %vm83_vm2, %v80_v45, %v82_v44  ;;  %v85_v47 = vsel %vm83_vm2, %v82_v44, %v80_v45 }
  0xf4   :  { %v104_v48 = vmul.f32 %v99_v40, %v85_v47  ;;  %v105_v49 = vmul.f32 %v103_v41, %v84_v46 }
  0xf6   :  { %v109_v52 = vpop.permute.xlu1 %108  ;;  %v107_v53 = vpop.permute.xlu0 %106  ;;  %v133_v58 = vadd.f32 %v104_v48, %v77_v33  ;;  %v134_v59 = vadd.f32 %v105_v49, %v78_v32 }
  0xf7   :  { %v111_v56 = vsel %vm110_vm3, %v107_v53, %v109_v52  ;;  %v112_v57 = vsel %vm110_vm3, %v109_v52, %v107_v53 }
  0xf8   :  { %v131_v60 = vmul.f32 %v126_v50, %v111_v56  ;;  %v132_v61 = vmul.f32 %v130_v51, %v112_v57 }
  0xfa   :  { %v135_v62 = vadd.f32 %v133_v58, %v131_v60  ;;  %v136_v63 = vadd.f32 %v134_v59, %v132_v61 }
  0xfc   :  { %v139_v2 = vsub.f32 %v137_v54, %v135_v62  ;;  %v140_v3 = vsub.f32 %v138_v55, %v136_v63 }
  0xfe   :  { %v142_v5 = vand.u32 2147483647, %v139_v2  ;;  %v143_v6 = vand.u32 2147483647, %v140_v3 }
 0x100   :  { %v145_v7 = vmul.f32 %v144_v4, %v142_v5  ;;  %v146_v0 = vmul.f32 %v144_v4, %v143_v6 }
 0x102   :  { %147 = vst [vmem:[%s214_s3] sm:$0x3f] %v145_v7  ;;  %148 = vst [vmem:[%s214_s3 + $0x8] sm:$0x3f] %v146_v0 }

</bundles_post_ra>
